<compile_context>
chip_gen: v7x
topology: tpu7x:2x2x1
jax: 0.10.0
libtpu: 0.0.40
codegen_flags: <defaults>
</compile_context>

<pallas_src>
import functools

import jax
import jax.numpy as jnp
from jax import lax
from jax.experimental import pallas as pl
from jax.experimental.pallas import tpu as pltpu

BATCH = 8
WIDTH = 32
DEPTH = 3  # number of times the (shared) hidden layer is applied


def mlp_kernel(x_ref, w_in_ref, b_in_ref, w_h_ref, b_h_ref, w_out_t_ref, b_out_ref, o_ref):
    # input layer: Linear(1, width) + Tanh
    # K=1 matmul -> pure VPU broadcast multiply (no MXU round trip)
    h = jnp.tanh(x_ref[...] * w_in_ref[...] + b_in_ref[...])

    # hoist the shared hidden-layer weights/bias into vregs once (loop is unrolled)
    w_h = w_h_ref[...]
    b_h = b_h_ref[...]

    # hidden layer (weight-shared, applied DEPTH times): Linear(width, width) + Tanh
    def body(_, h):
        return jnp.tanh(jnp.dot(h, w_h, preferred_element_type=jnp.float32) + b_h)

    h = lax.fori_loop(0, DEPTH, body, h, unroll=True)

    # output layer: Linear(width, 1)
    # N=1 matmul -> elementwise multiply + lane reduction (XLU), no MXU round trip
    o_ref[...] = (
        jnp.sum(h * w_out_t_ref[...], axis=-1, keepdims=True) + b_out_ref[...]
    ).astype(o_ref.dtype)


@functools.partial(jax.jit, static_argnames=("tile_batch",))
def mynetwork_forward(x, params, tile_batch=256):
    w_in, b_in, w_h, b_h, w_out, b_out = params
    batch = x.shape[0]
    width = w_h.shape[0]

    # (width, 1) -> (1, width): lane-dense row for the in-kernel output reduction
    w_out_t = w_out.T

    # pad batch up to a sublane multiple (8) and to a whole number of tiles
    b8 = ((batch + 7) // 8) * 8
    tb = min(tile_batch, b8)
    padded = ((b8 + tb - 1) // tb) * tb
    if padded != batch:
        x = jnp.pad(x, ((0, padded - batch), (0, 0)))

    grid = (padded // tb,)

    resident = lambda i: (0, 0)  # weights/biases: same block every grid step -> stay in VMEM
    out = pl.pallas_call(
        mlp_kernel,
        out_shape=jax.ShapeDtypeStruct((padded, 1), jnp.float32),
        grid=grid,
        in_specs=[
            pl.BlockSpec((tb, 1), lambda i: (i, 0)),        # x tile
            pl.BlockSpec((1, width), resident),             # w_in  (1, W)
            pl.BlockSpec((1, width), resident),             # b_in  (1, W)
            pl.BlockSpec((width, width), resident),         # w_h   (W, W)
            pl.BlockSpec((1, width), resident),             # b_h   (1, W)
            pl.BlockSpec((1, width), resident),             # w_out^T (1, W)
            pl.BlockSpec((1, 1), resident),                 # b_out (1, 1)
        ],
        out_specs=pl.BlockSpec((tb, 1), lambda i: (i, 0)),
        compiler_params=pltpu.CompilerParams(
            dimension_semantics=("parallel",),  # lets v7x shard batch tiles across its 2 TCs
        ),
    )(x, w_in, b_in, w_h, b_h, w_out_t, b_out)

    return out[:batch]


def init_params(key, width):
    """Deterministic init mimicking PyTorch nn.Linear default (U(-1/sqrt(fan_in), 1/sqrt(fan_in)))."""
    ks = jax.random.split(key, 6)

    def lin(kw, kb, fan_in, fan_out):
        bound = 1.0 / jnp.sqrt(fan_in)
        w = jax.random.uniform(kw, (fan_in, fan_out), jnp.float32, -bound, bound)
        b = jax.random.uniform(kb, (1, fan_out), jnp.float32, -bound, bound)
        return w, b

    w_in, b_in = lin(ks[0], ks[1], 1, width)
    w_h, b_h = lin(ks[2], ks[3], width, width)
    w_out, b_out = lin(ks[4], ks[5], width, 1)
    return w_in, b_in, w_h, b_h, w_out, b_out


def reference_forward(x, params):
    w_in, b_in, w_h, b_h, w_out, b_out = params
    h = jnp.tanh(x @ w_in + b_in)
    for _ in range(DEPTH):
        h = jnp.tanh(h @ w_h + b_h)
    return h @ w_out + b_out


if __name__ == "__main__":
    key = jax.random.PRNGKey(0)
    k_x, k_p = jax.random.split(key)
    x = jax.random.normal(k_x, (BATCH, 1), dtype=jnp.float32)
    params = init_params(k_p, WIDTH)

    out = mynetwork_forward(x, params)
    out = jax.block_until_ready(out)

    ref = reference_forward(x, params)
    assert out.shape == (BATCH, 1)
    assert jnp.allclose(out, ref, atol=1e-5, rtol=1e-5)
    print("KERNEL_OK")
</pallas_src>

<mosaic_0001>
module attributes {stable_mosaic.version = 11 : i64} {
  func.func @mlp_kernel(%arg0: i32, %arg1: memref<8x1xf32, #tpu.memory_space<vmem>>, %arg2: memref<1x32xf32, #tpu.memory_space<vmem>>, %arg3: memref<1x32xf32, #tpu.memory_space<vmem>>, %arg4: memref<32x32xf32, #tpu.memory_space<vmem>>, %arg5: memref<1x32xf32, #tpu.memory_space<vmem>>, %arg6: memref<1x32xf32, #tpu.memory_space<vmem>>, %arg7: memref<1x1xf32, #tpu.memory_space<vmem>>, %arg8: memref<8x1xf32, #tpu.memory_space<vmem>>) attributes {dimension_semantics = [#tpu.dimension_semantics<parallel>], iteration_bounds = array<i64: 1>, scalar_prefetch = 0 : i64, scratch_operands = 0 : i64, tpu.core_type = #tpu.core_type<tc>, window_params = [{transform_indices = @transform_0, window_bounds = array<i64: 8, 1>}, {pipeline_mode = #tpu.pipeline_mode<synchronous>, transform_indices = @transform_1, window_bounds = array<i64: 1, 32>}, {pipeline_mode = #tpu.pipeline_mode<synchronous>, transform_indices = @transform_2, window_bounds = array<i64: 1, 32>}, {pipeline_mode = #tpu.pipeline_mode<synchronous>, transform_indices = @transform_3, window_bounds = array<i64: 32, 32>}, {pipeline_mode = #tpu.pipeline_mode<synchronous>, transform_indices = @transform_4, window_bounds = array<i64: 1, 32>}, {pipeline_mode = #tpu.pipeline_mode<synchronous>, transform_indices = @transform_5, window_bounds = array<i64: 1, 32>}, {pipeline_mode = #tpu.pipeline_mode<synchronous>, transform_indices = @transform_6, window_bounds = array<i64: 1, 1>}, {transform_indices = @transform_7, window_bounds = array<i64: 8, 1>}]} {
    %c0 = arith.constant 0 : index
    %c0_0 = arith.constant 0 : index
    %0 = vector.load %arg1[%c0, %c0_0] : memref<8x1xf32, #tpu.memory_space<vmem>>, vector<8x1xf32>
    %c0_1 = arith.constant 0 : index
    %c0_2 = arith.constant 0 : index
    %1 = vector.load %arg2[%c0_1, %c0_2] : memref<1x32xf32, #tpu.memory_space<vmem>>, vector<1x32xf32>
    %2 = vector.broadcast %0 : vector<8x1xf32> to vector<8x32xf32>
    %3 = vector.broadcast %1 : vector<1x32xf32> to vector<8x32xf32>
    %4 = arith.mulf %2, %3 : vector<8x32xf32>
    %c0_3 = arith.constant 0 : index
    %c0_4 = arith.constant 0 : index
    %5 = vector.load %arg3[%c0_3, %c0_4] : memref<1x32xf32, #tpu.memory_space<vmem>>, vector<1x32xf32>
    %6 = vector.broadcast %5 : vector<1x32xf32> to vector<8x32xf32>
    %7 = arith.addf %4, %6 : vector<8x32xf32>
    %8 = math.tanh %7 : vector<8x32xf32>
    %c0_5 = arith.constant 0 : index
    %c0_6 = arith.constant 0 : index
    %9 = vector.load %arg4[%c0_5, %c0_6] : memref<32x32xf32, #tpu.memory_space<vmem>>, vector<32x32xf32>
    %c0_7 = arith.constant 0 : index
    %c0_8 = arith.constant 0 : index
    %10 = vector.load %arg5[%c0_7, %c0_8] : memref<1x32xf32, #tpu.memory_space<vmem>>, vector<1x32xf32>
    %c0_i32 = arith.constant 0 : i32
    %cst = arith.constant dense<0.000000e+00> : vector<8x32xf32>
    %11 = tpu.matmul %8, %9, %cst {dimension_numbers = #tpu.dot_dimension_numbers<[1], [0], [0], [1], [0, 0, 1, 1], [], []>} : vector<8x32xf32>, vector<32x32xf32>, vector<8x32xf32> -> vector<8x32xf32>
    %12 = vector.broadcast %10 : vector<1x32xf32> to vector<8x32xf32>
    %13 = arith.addf %11, %12 : vector<8x32xf32>
    %14 = math.tanh %13 : vector<8x32xf32>
    %c1_i32 = arith.constant 1 : i32
    %cst_9 = arith.constant dense<0.000000e+00> : vector<8x32xf32>
    %15 = tpu.matmul %14, %9, %cst_9 {dimension_numbers = #tpu.dot_dimension_numbers<[1], [0], [0], [1], [0, 0, 1, 1], [], []>} : vector<8x32xf32>, vector<32x32xf32>, vector<8x32xf32> -> vector<8x32xf32>
    %16 = vector.broadcast %10 : vector<1x32xf32> to vector<8x32xf32>
    %17 = arith.addf %15, %16 : vector<8x32xf32>
    %18 = math.tanh %17 : vector<8x32xf32>
    %c2_i32 = arith.constant 2 : i32
    %cst_10 = arith.constant dense<0.000000e+00> : vector<8x32xf32>
    %19 = tpu.matmul %18, %9, %cst_10 {dimension_numbers = #tpu.dot_dimension_numbers<[1], [0], [0], [1], [0, 0, 1, 1], [], []>} : vector<8x32xf32>, vector<32x32xf32>, vector<8x32xf32> -> vector<8x32xf32>
    %20 = vector.broadcast %10 : vector<1x32xf32> to vector<8x32xf32>
    %21 = arith.addf %19, %20 : vector<8x32xf32>
    %22 = math.tanh %21 : vector<8x32xf32>
    %c0_11 = arith.constant 0 : index
    %c0_12 = arith.constant 0 : index
    %23 = vector.load %arg6[%c0_11, %c0_12] : memref<1x32xf32, #tpu.memory_space<vmem>>, vector<1x32xf32>
    %24 = vector.broadcast %23 : vector<1x32xf32> to vector<8x32xf32>
    %25 = arith.mulf %22, %24 : vector<8x32xf32>
    %cst_13 = arith.constant dense<0.000000e+00> : vector<8xf32>
    %26 = vector.multi_reduction <add>, %25, %cst_13 [1] : vector<8x32xf32> to vector<8xf32>
    %27 = vector.shape_cast %26 : vector<8xf32> to vector<8x1xf32>
    %c0_14 = arith.constant 0 : index
    %c0_15 = arith.constant 0 : index
    %28 = vector.load %arg7[%c0_14, %c0_15] : memref<1x1xf32, #tpu.memory_space<vmem>>, vector<1x1xf32>
    %29 = vector.broadcast %28 : vector<1x1xf32> to vector<8x1xf32>
    %30 = arith.addf %27, %29 : vector<8x1xf32>
    %c0_16 = arith.constant 0 : index
    %c0_17 = arith.constant 0 : index
    %31 = vector.load %arg8[%c0_16, %c0_17] : memref<8x1xf32, #tpu.memory_space<vmem>>, vector<8x1xf32>
    tpu.vector_store %arg8[%c0_16, %c0_17], %30 {strides = array<i32>} : memref<8x1xf32, #tpu.memory_space<vmem>>, vector<8x1xf32>,
    return
  }
  func.func @transform_0(%arg0: i32) -> (i32, i32) {
    %c0_i32 = arith.constant 0 : i32
    %c0_i32_0 = arith.constant 0 : i32
    return %arg0, %c0_i32 : i32, i32
  }
  func.func @transform_1(%arg0: i32) -> (i32, i32) {
    %c0_i32 = arith.constant 0 : i32
    %c0_i32_0 = arith.constant 0 : i32
    %c0_i32_1 = arith.constant 0 : i32
    return %c0_i32, %c0_i32_0 : i32, i32
  }
  func.func @transform_2(%arg0: i32) -> (i32, i32) {
    %c0_i32 = arith.constant 0 : i32
    %c0_i32_0 = arith.constant 0 : i32
    %c0_i32_1 = arith.constant 0 : i32
    return %c0_i32, %c0_i32_0 : i32, i32
  }
  func.func @transform_3(%arg0: i32) -> (i32, i32) {
    %c0_i32 = arith.constant 0 : i32
    %c0_i32_0 = arith.constant 0 : i32
    %c0_i32_1 = arith.constant 0 : i32
    return %c0_i32, %c0_i32_0 : i32, i32
  }
  func.func @transform_4(%arg0: i32) -> (i32, i32) {
    %c0_i32 = arith.constant 0 : i32
    %c0_i32_0 = arith.constant 0 : i32
    %c0_i32_1 = arith.constant 0 : i32
    return %c0_i32, %c0_i32_0 : i32, i32
  }
  func.func @transform_5(%arg0: i32) -> (i32, i32) {
    %c0_i32 = arith.constant 0 : i32
    %c0_i32_0 = arith.constant 0 : i32
    %c0_i32_1 = arith.constant 0 : i32
    return %c0_i32, %c0_i32_0 : i32, i32
  }
  func.func @transform_6(%arg0: i32) -> (i32, i32) {
    %c0_i32 = arith.constant 0 : i32
    %c0_i32_0 = arith.constant 0 : i32
    %c0_i32_1 = arith.constant 0 : i32
    return %c0_i32, %c0_i32_0 : i32, i32
  }
  func.func @transform_7(%arg0: i32) -> (i32, i32) {
    %c0_i32 = arith.constant 0 : i32
    %c0_i32_0 = arith.constant 0 : i32
    return %arg0, %c0_i32 : i32, i32
  }
}

</mosaic_0001>

<bundles_post_ra>
// kernel: mynetwork_forward.1
= control target key start
LH: loop header
LB: loop body
LE: loop exit
PB: predicated region body
PF: predicated region fallthrough
CT: control target
= control target key end

     0   :  { %s526_s0 = inlined_call_operand.vmem [shape: f32[8,1], index: 0, kind: input, shape index: {}]   ;;  %s527_s1 = inlined_call_operand.vmem [shape: f32[1,32], index: 1, kind: input, shape index: {}]   ;;  %s528_s2 = inlined_call_operand.vmem [shape: f32[1,32], index: 2, kind: input, shape index: {}]   ;;  %s529_s3 = inlined_call_operand.hbm [shape: f32[32,32], index: 3, kind: input, shape index: {}]   ;;  %s530_s4 = inlined_call_operand.vmem [shape: f32[1,32], index: 4, kind: input, shape index: {}]   ;;  %s531_s5 = inlined_call_operand.vmem [shape: f32[1,32], index: 5, kind: input, shape index: {}]   ;;  %s532_s6 = inlined_call_operand.<no memory space> [shape: f32[1,1], index: 6, kind: input, shape index: {}]   ;;  %s533_s7 = inlined_call_operand.vmem [shape: f32[8,1], index: 7, kind: output, shape index: {}]  }
   0x1   :  { %v12_v0 = vstv %s532_s6 }
   0x2   :  { %13 = vst [vmem:[#allocation2] sm:$0x1] %v12_v0 }
   0x3   :  { %14 = vsyncpa [#allocation4], 0  ;;  %s439_s26 = smov [#allocation3]   ;;  %s415_s30 = scalar_lea.hbm %s529_s3, 512 }
   0x4   :  { %s26_s27 = sshll.u32 %s439_s26, 4  ;;  %p416_p0 = scmp.ne.s32.totalorder %s529_s3, %s415_s30  ;;  %s27_s27 = int_to_ptr.vmem [resolvable:$true] %s26_s27 }
   0x5   :  { %p419_p1 = scmp.lt.u32.totalorder %s415_s30, %s529_s3 }
   0x7   :  { %p421_p2 = pnand %p419_p1, %p416_p0 }
   0x9   :  { %424 = shalt.err (!%p421_p2)
}
   0xa   :  { %s425_s6 = scalar_lea.vmem %s27_s27, 512  ;;  %p430_p4 = scmp.lt.s32.totalorder %s27_s27, %s27_s27 }
   0xb   :  { %p426_p3 = scmp.ne.s32.totalorder %s27_s27, %s425_s6  ;;  %p431_p5 = scmp.lt.s32.totalorder %s425_s6, %s425_s6 }
   0xd   :  { %p432_p6 = por %p431_p5, %p430_p4 }
   0xf   :  { %p433_p7 = pnand %p432_p6, %p426_p3 }
  0x11   :  { %436 = shalt.err (!%p433_p7)
}
  0x12   :  { %s440_s12 = smov 128   ;;  %s441_s13 = smov 8  }
  0x13   :  { %32 = dma.hbm_to_vmem [thread:$0]  %s529_s3, 512, %s27_s27, [#allocation4], %s440_s12, %s440_s12, %s441_s13  }
  0x14   :  { %437 = dma.done.wait [#allocation4], 512  }
  0x15   :  { %438 = vsyncadd [#allocation4], 4294966784  ;;  %v442_v1 = vmov 0   ;;  %v42_v2 = vld [vmem:[%s526_s0] sm:$0xff]  ;;  %v66_v4 = vld [vmem:[#allocation3 + $0x8] sm:$0xff]  ;;  %v443_v6 = vmov 0.0|0.0  }
  0x16   :  { %406 = vset.pattern.permute.xlu0 %v442_v1  ;;  %v65_v3 = vld [vmem:[#allocation3] sm:$0xff]  ;;  %v67_v5 = vld [vmem:[#allocation3 + $0x10] sm:$0xff]  ;;  %381 = vmatprep.subr.bf16.mxu0 %v443_v6  ;;  %v68_v8 = vld [vmem:[#allocation3 + $0x18] sm:$0xff]  ;;  %vm444_vm0 = vmmov 0   ;;  %v445_v9 = vmov 0.0   ;;  %vm76_vm1 = vcmask 261120  }
  0x17   :  { %46 = vperm.xlu0 %406, %v42_v2   ;;  %v382_v7 = vpack.c.bf16 %v66_v4, %v65_v3  ;;  %356 = vmatprep.mubr.msk.f32.mxu0 %vm444_vm0, %v445_v9  ;;  %v385_v10 = vpack.c.bf16 %v68_v8, %v67_v5  ;;  %v325_v11 = vld [vmem:[%s527_s1] ss:$0 sm:$0xff]  ;;  %vm318_vm2 = vcmask 7168  }
  0x18   :  { %387 = vmatprep.subr.bf16.mxu1 %v443_v6  ;;  %367 = vmatprep.mubr.msk.f32.mxu1 %vm444_vm0, %v445_v9  ;;  %v326_v12 = vld [vmem:[%s528_s2] ss:$0 sm:$0xff] }
  0x19   :  { %383 = vmatpush3.bf16.msra.mxu0 %v382_v7  ;;  %389 = vmatpush3.bf16.msra.mxu1 %v382_v7  ;;  %v327_v17 = vld [vmem:[%s530_s4] ss:$0 sm:$0xff] }
  0x1a   :  { %384 = vmatprep.subr.bf16.mxu0 %v443_v6  ;;  %390 = vmatprep.subr.bf16.mxu1 %v443_v6  ;;  %v331_v29 = vld [vmem:[%s531_s5] ss:$0 sm:$0xff] }
  0x1b   :  { %v332_v33 = vld [vmem:[#allocation2] ss:$0 sm:$0xff] }
  0x1d   :  { %386 = vmatpush3.bf16.msra.mxu0 %v385_v10  ;;  %392 = vmatpush3.bf16.msra.mxu1 %v385_v10 }
  0x1e   :  { %393 = vmatprep.subr.bf16.mxu0 %v443_v6 }
  0x96   :  { %v47_v13 = vpop.permute.xlu0 %46 }
  0x97   :  { %v55_v14 = vmul.f32 %v325_v11, %v47_v13 }
  0x99   :  { %v63_v15 = vadd.f32 %v326_v12, %v55_v14 }
  0x9b   :  { %407 = vtanh.f32 %v63_v15 }
  0xa5   :  { %v408_v16 = vpop.eup %407 }
  0xa6   :  { %357 = vmatmul.mubr.msk.f32.vlgmr.msra.gmra.mrb[0].mxu0 %vm76_vm1, %v408_v16 }
  0xa7   :  { %395 = vmatpush3.bf16.msra.mxu0 %v382_v7  ;;  %378 = vmatprep.mubr.msk.f32.mxu0 %vm444_vm0, %v445_v9 }
  0xa8   :  { %396 = vmatprep.subr.bf16.mxu0 %v443_v6 }
  0xab   :  { %398 = vmatpush3.bf16.msra.mxu0 %v385_v10 }
 0x179   :  { %v146_v18 = vpop.f32.mrb[0].mxu0 }
 0x17a   :  { %v147_v19 = vadd.f32 %v327_v17, %v146_v18  ;;  %v358_v20 = vpop.f32.mrb[1].mxu0 }
 0x17c   :  { %409 = vtanh.f32 %v147_v19 }
 0x186   :  { %v410_v21 = vpop.eup %409 }
 0x187   :  { %368 = vmatmul.mubr.msk.f32.vlgmr.msra.gmra.mrb[0].mxu1 %vm76_vm1, %v410_v21 }
 0x25a   :  { %v220_v22 = vpop.f32.mrb[0].mxu1 }
 0x25b   :  { %v221_v23 = vadd.f32 %v327_v17, %v220_v22  ;;  %v369_v24 = vpop.f32.mrb[1].mxu1 }
 0x25d   :  { %411 = vtanh.f32 %v221_v23 }
 0x267   :  { %v412_v25 = vpop.eup %411 }
 0x268   :  { %379 = vmatmul.mubr.msk.f32.vlgmr.msra.gmra.mrb[2].mxu0 %vm76_vm1, %v412_v25 }
 0x33b   :  { %v294_v26 = vpop.f32.mrb[2].mxu0 }
 0x33c   :  { %v295_v27 = vadd.f32 %v327_v17, %v294_v26  ;;  %v380_v28 = vpop.f32.mrb[3].mxu0 }
 0x33e   :  { %413 = vtanh.f32 %v295_v27 }
 0x348   :  { %v414_v30 = vpop.eup %413 }
 0x349   :  { %v306_v31 = vmul.f32 %v414_v30, %v331_v29 }
 0x34b   :  { %v307_v32 = vsel %vm76_vm1, %v306_v31, 0.0 }
 0x34c   :  { %308 = vadd.xlane.f32.xlu0 %v307_v32 }
 0x3d9   :  { %v309_v34 = vpop.xlane.xlu0 %308 }
 0x3da   :  { %v317_v35 = vadd.f32 %v332_v33, %v309_v34 }
 0x3dc   :  { %319 = vst.msk [vmem:[%s533_s7] sm:$0xff] %vm318_vm2, %v317_v35 }
 0x3dd   :  { %324 = vsyncpa [#allocation4], 1 }

</bundles_post_ra>
